<compile_context>
chip_gen: v7x
topology: tpu7x:2x2x1
jax: 0.10.0
libtpu: 0.0.40
codegen_flags: <defaults>
</compile_context>

<pallas_src>
import jax
import jax.numpy as jnp
from jax.experimental import pallas as pl
from jax.experimental.pallas import tpu as pltpu


def _round_up(x, m):
    return (x + m - 1) // m * m


def _act(name, x):
    if name == "tanh":
        return jnp.tanh(x)
    if name == "relu":
        return jnp.maximum(x, 0.0)
    if name == "sigmoid":
        return jax.nn.sigmoid(x)
    if name == "leaky":
        return jnp.where(x >= 0, x, 0.01 * x)
    raise ValueError(name)


def make_mlp_kernel(afunction):
    def mlp_kernel(x_ref, w1_ref, b1_ref, w2_ref, b2_ref, o_ref):
        # Cast x to the weight dtype (bf16) in-kernel (cheap VPU cast, hidden
        # under MXU work) rather than in the wrapper (which would add an extra
        # HBM read+write pass over x).
        x = x_ref[...].astype(w1_ref.dtype)
        # hidden = act(x @ W1 + b1) : MXU matmul with f32 accumulate, f32 bias,
        # activation on the f32 accumulator (EUP slot, effectively free).
        h = jnp.dot(x, w1_ref[...], preferred_element_type=jnp.float32)
        h = _act(afunction, h + b1_ref[...])
        # out = h @ W2 + b2
        y = jnp.dot(h.astype(w2_ref.dtype), w2_ref[...],
                    preferred_element_type=jnp.float32)
        o_ref[...] = (y + b2_ref[...]).astype(o_ref.dtype)
    return mlp_kernel


def prepare_mlp_params(w1, b1, w2, b2, lane=128, param_dtype=jnp.bfloat16):
    """One-time parameter prep (do this at init, NOT per forward call).

    PyTorch layout (W: [out, in], b: [out]) -> kernel layout:
      * W transposed to [in, out];
      * hidden dim zero-padded to a multiple of `lane` (128; use 256 when the
        hidden dim is scaled up on v6e/v7x) so the intermediate tile is
        lane-dense / MXU-friendly;
      * weights stored in `param_dtype` (bf16 by default), biases kept f32.

    The zero padding is exact for every supported activation: padded hidden
    pre-activations are exactly 0 (zero W1 columns, zero bias), and even when
    act(0) != 0 (e.g. sigmoid) those hidden units multiply ZERO ROWS of w2_t,
    so they contribute nothing.  Do not break that invariant when refactoring.
    """
    H, D_in = w1.shape
    D_out = w2.shape[0]
    H_pad = _round_up(H, lane)

    w1_t = jnp.zeros((D_in, H_pad), param_dtype).at[:, :H].set(w1.T.astype(param_dtype))
    b1_r = jnp.zeros((1, H_pad), jnp.float32).at[0, :H].set(b1.astype(jnp.float32))
    w2_t = jnp.zeros((H_pad, D_out), param_dtype).at[:H, :].set(w2.T.astype(param_dtype))
    b2_r = b2.astype(jnp.float32).reshape(1, D_out)

    return {"w1_t": w1_t, "b1": b1_r, "w2_t": w2_t, "b2": b2_r}


def mlp_forward(x, params, afunction="tanh", block_b=512, num_cores=2,
                out_dtype=jnp.float32):
    """x: [B, D_in]; params from prepare_mlp_params.

    Matches torch nn.Linear semantics: y = act(x @ W1.T + b1) @ W2.T + b2.
    Batch is tiled over a 1-D "parallel" grid (weights resident, x/o stream).
    Many per-instance calls should be stacked into one big batch.
    """
    w1_t, b1_r = params["w1_t"], params["b1"]
    w2_t, b2_r = params["w2_t"], params["b2"]

    B, D_in = x.shape
    H_pad = w1_t.shape[1]
    D_out = w2_t.shape[1]

    # Batch tile: big tiles amortize per-grid-step overhead; no jnp.pad of x
    # (Pallas masks the trailing partial tile).  For moderate B, cap the tile
    # so there are >=2 grid steps (uses both TensorCores on v7x).
    if B > block_b:
        tb = block_b                                   # multiple of 8
    else:
        half = _round_up(pl.cdiv(B, num_cores), 8)
        tb = half if half < B else B                   # tb==B -> block == full dim (legal for any B)
    grid_b = pl.cdiv(B, tb)

    itemsize = lambda a: jnp.dtype(a.dtype).itemsize
    w_bytes = sum(int(a.size) * itemsize(a) for a in (w1_t, b1_r, w2_t, b2_r))
    tile_bytes = tb * D_in * itemsize(x) + tb * D_out * jnp.dtype(out_dtype).itemsize
    vmem_limit = int(min(64 << 20,
                         max(16 << 20,
                             w_bytes + 2 * tile_bytes + 2 * tb * H_pad * 4 + (8 << 20))))

    cost = pl.CostEstimate(
        flops=2 * B * (D_in * H_pad + H_pad * D_out),
        transcendentals=B * H_pad,
        bytes_accessed=int(B * D_in * itemsize(x) + w_bytes
                           + B * D_out * jnp.dtype(out_dtype).itemsize),
    )

    kernel = make_mlp_kernel(afunction)

    def call(single_buffer_weights):
        resident = ({"pipeline_mode": pl.Buffered(1)} if single_buffer_weights else {})
        return pl.pallas_call(
            kernel,
            out_shape=jax.ShapeDtypeStruct((B, D_out), out_dtype),
            grid=(grid_b,),
            in_specs=[
                pl.BlockSpec((tb, D_in), lambda i: (i, 0)),                    # streams
                pl.BlockSpec((D_in, H_pad), lambda i: (0, 0), **resident),     # resident W1
                pl.BlockSpec((1, H_pad), lambda i: (0, 0), **resident),        # resident b1
                pl.BlockSpec((H_pad, D_out), lambda i: (0, 0), **resident),    # resident W2
                pl.BlockSpec((1, D_out), lambda i: (0, 0), **resident),        # resident b2
            ],
            out_specs=pl.BlockSpec((tb, D_out), lambda i: (i, 0)),             # unpadded writeback
            compiler_params=pltpu.CompilerParams(
                dimension_semantics=("parallel",),
                vmem_limit_bytes=vmem_limit),
            cost_estimate=cost,
        )(x, w1_t, b1_r, w2_t, b2_r)

    try:
        return call(True)
    except Exception:
        # pl.Buffered(1) not accepted on this jax version: fall back to the
        # default double-buffered resident blocks (identical results).
        return call(False)


if __name__ == "__main__":
    # Shapes implied by the module: MLP(input_size=32, output_size=16,
    # n_neurons=64, afunction='tanh'), batch of 8.
    B, D_in, H, D_out = 8, 32, 64, 16
    afunction = "tanh"

    key = jax.random.PRNGKey(0)
    kx, kw1, kb1, kw2, kb2 = jax.random.split(key, 5)

    x = jax.random.normal(kx, (B, D_in), dtype=jnp.float32)
    # PyTorch-shaped params: W: (out, in), b: (out,)
    w1 = jax.random.normal(kw1, (H, D_in), dtype=jnp.float32) * 0.1
    b1 = jax.random.normal(kb1, (H,), dtype=jnp.float32) * 0.1
    w2 = jax.random.normal(kw2, (D_out, H), dtype=jnp.float32) * 0.1
    b2 = jax.random.normal(kb2, (D_out,), dtype=jnp.float32) * 0.1

    # One-time param prep (transpose + lane padding + bf16 weights), then the
    # fused forward.
    params = prepare_mlp_params(w1, b1, w2, b2)
    out = mlp_forward(x, params, afunction)
    out = jax.block_until_ready(out)

    # Pure-JAX f32 reference; tolerance loosened for bf16 weights with f32
    # accumulation (error stays ~1e-3 at these scales).
    ref = jnp.tanh(x @ w1.T + b1) @ w2.T + b2
    assert out.shape == (B, D_out)
    assert jnp.allclose(out, ref, atol=3e-2, rtol=3e-2), "mismatch vs reference"

    print("KERNEL_OK")
</pallas_src>

<mosaic_0001>
module attributes {stable_mosaic.version = 11 : i64} {
  func.func @mlp_kernel(%arg0: i32, %arg1: memref<8x32xf32, #tpu.memory_space<vmem>>, %arg2: memref<32x128xbf16, #tpu.memory_space<vmem>>, %arg3: memref<1x128xf32, #tpu.memory_space<vmem>>, %arg4: memref<128x16xbf16, #tpu.memory_space<vmem>>, %arg5: memref<1x16xf32, #tpu.memory_space<vmem>>, %arg6: memref<8x16xf32, #tpu.memory_space<vmem>>) attributes {dimension_semantics = [#tpu.dimension_semantics<parallel>], iteration_bounds = array<i64: 1>, scalar_prefetch = 0 : i64, scratch_operands = 0 : i64, tpu.core_type = #tpu.core_type<tc>, window_params = [{transform_indices = @transform_0, window_bounds = array<i64: 8, 32>}, {pipeline_mode = #tpu.pipeline_mode<synchronous>, transform_indices = @transform_1, window_bounds = array<i64: 32, 128>}, {pipeline_mode = #tpu.pipeline_mode<synchronous>, transform_indices = @transform_2, window_bounds = array<i64: 1, 128>}, {pipeline_mode = #tpu.pipeline_mode<synchronous>, transform_indices = @transform_3, window_bounds = array<i64: 128, 16>}, {pipeline_mode = #tpu.pipeline_mode<synchronous>, transform_indices = @transform_4, window_bounds = array<i64: 1, 16>}, {transform_indices = @transform_5, window_bounds = array<i64: 8, 16>}]} {
    %c0 = arith.constant 0 : index
    %c0_0 = arith.constant 0 : index
    %0 = vector.load %arg1[%c0, %c0_0] : memref<8x32xf32, #tpu.memory_space<vmem>>, vector<8x32xf32>
    %1 = arith.truncf %0 : vector<8x32xf32> to vector<8x32xbf16>
    %c0_1 = arith.constant 0 : index
    %c0_2 = arith.constant 0 : index
    %2 = vector.load %arg2[%c0_1, %c0_2] : memref<32x128xbf16, #tpu.memory_space<vmem>>, vector<32x128xbf16>
    %cst = arith.constant dense<0.000000e+00> : vector<8x128xf32>
    %3 = tpu.matmul %1, %2, %cst {dimension_numbers = #tpu.dot_dimension_numbers<[1], [0], [0], [1], [0, 0, 1, 1], [], []>} : vector<8x32xbf16>, vector<32x128xbf16>, vector<8x128xf32> -> vector<8x128xf32>
    %c0_3 = arith.constant 0 : index
    %c0_4 = arith.constant 0 : index
    %4 = vector.load %arg3[%c0_3, %c0_4] : memref<1x128xf32, #tpu.memory_space<vmem>>, vector<1x128xf32>
    %5 = vector.broadcast %4 : vector<1x128xf32> to vector<8x128xf32>
    %6 = arith.addf %3, %5 : vector<8x128xf32>
    %7 = math.tanh %6 : vector<8x128xf32>
    %8 = arith.truncf %7 : vector<8x128xf32> to vector<8x128xbf16>
    %c0_5 = arith.constant 0 : index
    %c0_6 = arith.constant 0 : index
    %9 = vector.load %arg4[%c0_5, %c0_6] : memref<128x16xbf16, #tpu.memory_space<vmem>>, vector<128x16xbf16>
    %cst_7 = arith.constant dense<0.000000e+00> : vector<8x16xf32>
    %10 = tpu.matmul %8, %9, %cst_7 {dimension_numbers = #tpu.dot_dimension_numbers<[1], [0], [0], [1], [0, 0, 1, 1], [], []>} : vector<8x128xbf16>, vector<128x16xbf16>, vector<8x16xf32> -> vector<8x16xf32>
    %c0_8 = arith.constant 0 : index
    %c0_9 = arith.constant 0 : index
    %11 = vector.load %arg5[%c0_8, %c0_9] : memref<1x16xf32, #tpu.memory_space<vmem>>, vector<1x16xf32>
    %12 = vector.broadcast %11 : vector<1x16xf32> to vector<8x16xf32>
    %13 = arith.addf %10, %12 : vector<8x16xf32>
    %c0_10 = arith.constant 0 : index
    %c0_11 = arith.constant 0 : index
    %14 = vector.load %arg6[%c0_10, %c0_11] : memref<8x16xf32, #tpu.memory_space<vmem>>, vector<8x16xf32>
    tpu.vector_store %arg6[%c0_10, %c0_11], %13 {strides = array<i32>} : memref<8x16xf32, #tpu.memory_space<vmem>>, vector<8x16xf32>,
    return
  }
  func.func @transform_0(%arg0: i32) -> (i32, i32) {
    %c0_i32 = arith.constant 0 : i32
    %c0_i32_0 = arith.constant 0 : i32
    return %arg0, %c0_i32 : i32, i32
  }
  func.func @transform_1(%arg0: i32) -> (i32, i32) {
    %c0_i32 = arith.constant 0 : i32
    %c0_i32_0 = arith.constant 0 : i32
    %c0_i32_1 = arith.constant 0 : i32
    return %c0_i32, %c0_i32_0 : i32, i32
  }
  func.func @transform_2(%arg0: i32) -> (i32, i32) {
    %c0_i32 = arith.constant 0 : i32
    %c0_i32_0 = arith.constant 0 : i32
    %c0_i32_1 = arith.constant 0 : i32
    return %c0_i32, %c0_i32_0 : i32, i32
  }
  func.func @transform_3(%arg0: i32) -> (i32, i32) {
    %c0_i32 = arith.constant 0 : i32
    %c0_i32_0 = arith.constant 0 : i32
    %c0_i32_1 = arith.constant 0 : i32
    return %c0_i32, %c0_i32_0 : i32, i32
  }
  func.func @transform_4(%arg0: i32) -> (i32, i32) {
    %c0_i32 = arith.constant 0 : i32
    %c0_i32_0 = arith.constant 0 : i32
    %c0_i32_1 = arith.constant 0 : i32
    return %c0_i32, %c0_i32_0 : i32, i32
  }
  func.func @transform_5(%arg0: i32) -> (i32, i32) {
    %c0_i32 = arith.constant 0 : i32
    %c0_i32_0 = arith.constant 0 : i32
    return %arg0, %c0_i32 : i32, i32
  }
}

module attributes {stable_mosaic.version = 11 : i64} {
  func.func @mlp_kernel(%arg0: i32, %arg1: memref<8x32xf32, #tpu.memory_space<vmem>>, %arg2: memref<32x128xbf16, #tpu.memory_space<vmem>>, %arg3: memref<1x128xf32, #tpu.memory_space<vmem>>, %arg4: memref<128x16xbf16, #tpu.memory_space<vmem>>, %arg5: memref<1x16xf32, #tpu.memory_space<vmem>>, %arg6: memref<8x16xf32, #tpu.memory_space<vmem>>) attributes {dimension_semantics = [#tpu.dimension_semantics<parallel>], iteration_bounds = array<i64: 1>, scalar_prefetch = 0 : i64, scratch_operands = 0 : i64, tpu.core_type = #tpu.core_type<tc>, window_params = [{transform_indices = @transform_0, window_bounds = array<i64: 8, 32>}, {pipeline_mode = #tpu.pipeline_mode<synchronous>, transform_indices = @transform_1, window_bounds = array<i64: 32, 128>}, {pipeline_mode = #tpu.pipeline_mode<synchronous>, transform_indices = @transform_2, window_bounds = array<i64: 1, 128>}, {pipeline_mode = #tpu.pipeline_mode<synchronous>, transform_indices = @transform_3, window_bounds = array<i64: 128, 16>}, {pipeline_mode = #tpu.pipeline_mode<synchronous>, transform_indices = @transform_4, window_bounds = array<i64: 1, 16>}, {transform_indices = @transform_5, window_bounds = array<i64: 8, 16>}]} {
    %c0 = arith.constant 0 : index
    %c0_0 = arith.constant 0 : index
    %0 = vector.load %arg1[%c0, %c0_0] : memref<8x32xf32, #tpu.memory_space<vmem>>, vector<8x32xf32>
    %1 = arith.truncf %0 : vector<8x32xf32> to vector<8x32xbf16>
    %c0_1 = arith.constant 0 : index
    %c0_2 = arith.constant 0 : index
    %2 = vector.load %arg2[%c0_1, %c0_2] : memref<32x128xbf16, #tpu.memory_space<vmem>>, vector<32x128xbf16>
    %cst = arith.constant dense<0.000000e+00> : vector<8x128xf32>
    %3 = tpu.matmul %1, %2, %cst {dimension_numbers = #tpu.dot_dimension_numbers<[1], [0], [0], [1], [0, 0, 1, 1], [], []>} : vector<8x32xbf16>, vector<32x128xbf16>, vector<8x128xf32> -> vector<8x128xf32>
    %c0_3 = arith.constant 0 : index
    %c0_4 = arith.constant 0 : index
    %4 = vector.load %arg3[%c0_3, %c0_4] : memref<1x128xf32, #tpu.memory_space<vmem>>, vector<1x128xf32>
    %5 = vector.broadcast %4 : vector<1x128xf32> to vector<8x128xf32>
    %6 = arith.addf %3, %5 : vector<8x128xf32>
    %7 = math.tanh %6 : vector<8x128xf32>
    %8 = arith.truncf %7 : vector<8x128xf32> to vector<8x128xbf16>
    %c0_5 = arith.constant 0 : index
    %c0_6 = arith.constant 0 : index
    %9 = vector.load %arg4[%c0_5, %c0_6] : memref<128x16xbf16, #tpu.memory_space<vmem>>, vector<128x16xbf16>
    %cst_7 = arith.constant dense<0.000000e+00> : vector<8x16xf32>
    %10 = tpu.matmul %8, %9, %cst_7 {dimension_numbers = #tpu.dot_dimension_numbers<[1], [0], [0], [1], [0, 0, 1, 1], [], []>} : vector<8x128xbf16>, vector<128x16xbf16>, vector<8x16xf32> -> vector<8x16xf32>
    %c0_8 = arith.constant 0 : index
    %c0_9 = arith.constant 0 : index
    %11 = vector.load %arg5[%c0_8, %c0_9] : memref<1x16xf32, #tpu.memory_space<vmem>>, vector<1x16xf32>
    %12 = vector.broadcast %11 : vector<1x16xf32> to vector<8x16xf32>
    %13 = arith.addf %10, %12 : vector<8x16xf32>
    %c0_10 = arith.constant 0 : index
    %c0_11 = arith.constant 0 : index
    %14 = vector.load %arg6[%c0_10, %c0_11] : memref<8x16xf32, #tpu.memory_space<vmem>>, vector<8x16xf32>
    tpu.vector_store %arg6[%c0_10, %c0_11], %13 {strides = array<i32>} : memref<8x16xf32, #tpu.memory_space<vmem>>, vector<8x16xf32>,
    return
  }
  func.func @transform_0(%arg0: i32) -> (i32, i32) {
    %c0_i32 = arith.constant 0 : i32
    %c0_i32_0 = arith.constant 0 : i32
    return %arg0, %c0_i32 : i32, i32
  }
  func.func @transform_1(%arg0: i32) -> (i32, i32) {
    %c0_i32 = arith.constant 0 : i32
    %c0_i32_0 = arith.constant 0 : i32
    %c0_i32_1 = arith.constant 0 : i32
    return %c0_i32, %c0_i32_0 : i32, i32
  }
  func.func @transform_2(%arg0: i32) -> (i32, i32) {
    %c0_i32 = arith.constant 0 : i32
    %c0_i32_0 = arith.constant 0 : i32
    %c0_i32_1 = arith.constant 0 : i32
    return %c0_i32, %c0_i32_0 : i32, i32
  }
  func.func @transform_3(%arg0: i32) -> (i32, i32) {
    %c0_i32 = arith.constant 0 : i32
    %c0_i32_0 = arith.constant 0 : i32
    %c0_i32_1 = arith.constant 0 : i32
    return %c0_i32, %c0_i32_0 : i32, i32
  }
  func.func @transform_4(%arg0: i32) -> (i32, i32) {
    %c0_i32 = arith.constant 0 : i32
    %c0_i32_0 = arith.constant 0 : i32
    %c0_i32_1 = arith.constant 0 : i32
    return %c0_i32, %c0_i32_0 : i32, i32
  }
  func.func @transform_5(%arg0: i32) -> (i32, i32) {
    %c0_i32 = arith.constant 0 : i32
    %c0_i32_0 = arith.constant 0 : i32
    return %arg0, %c0_i32 : i32, i32
  }
}

</mosaic_0001>

<bundles_post_ra>
// kernel: tpu_custom_call.1
= control target key start
LH: loop header
LB: loop body
LE: loop exit
PB: predicated region body
PF: predicated region fallthrough
CT: control target
= control target key end

     0   :  { %v312_v1 = vmov 0.0   ;;  %vm313_vm0 = vmmov 0   ;;  %vm47_vm1 = vcmask 261120   ;;  %s396_s0 = inlined_call_operand.vmem [shape: f32[8,32], index: 0, kind: input, shape index: {}]   ;;  %s397_s1 = inlined_call_operand.vmem [shape: bf16[32,128], index: 1, kind: input, shape index: {}]   ;;  %s398_s2 = inlined_call_operand.vmem [shape: f32[1,128], index: 2, kind: input, shape index: {}]   ;;  %s399_s3 = inlined_call_operand.vmem [shape: bf16[128,16], index: 3, kind: input, shape index: {}]   ;;  %s400_s4 = inlined_call_operand.vmem [shape: f32[1,16], index: 4, kind: input, shape index: {}]   ;;  %s401_s5 = inlined_call_operand.hbm [shape: f32[8,16], index: 5, kind: output, shape index: {}]  }
   0x1   :  { %v276_v0 = vld [vmem:[%s397_s1] sm:$0xff]   ;;  %245 = vmatprep.subr.bf16.mxu0 %v312_v1  ;;  %v277_v2 = vld [vmem:[%s397_s1 + $0x8] sm:$0xff]   ;;  %253 = vmatprep.subr.bf16.mxu1 %v312_v1  ;;  %v280_v7 = vld [vmem:[%s399_s3 + $0x10] sm:$0xff]  }
   0x2   :  { %246 = vmatpush3.bf16.msra.mxu0 %v276_v0  ;;  %249 = vmatprep.mubr.msk.bf16.mxu0 %vm313_vm0, %v312_v1  ;;  %v22_v3 = vld [vmem:[%s396_s0] sm:$0xff]  ;;  %v279_v6 = vld [vmem:[%s399_s3 + $0x8] sm:$0xff]  }
   0x3   :  { %247 = vmatprep.subr.bf16.mxu0 %v312_v1  ;;  %v278_v4 = vld [vmem:[%s399_s3] sm:$0xff]   ;;  %269 = vmatprep.mubr.msk.bf16.mxu1 %vm313_vm0, %v312_v1  ;;  %v23_v5 = vpack.c.bf16 %v22_v3, %v22_v3 }
   0x4   :  { %254 = vmatpush3.bf16.msra.mxu1 %v278_v4 }
   0x5   :  { %255 = vmatprep.subr.bf16.mxu1 %v312_v1 }
   0x6   :  { %248 = vmatpush3.bf16.msra.mxu0 %v277_v2 }
   0x8   :  { %256 = vmatpush3.bf16.msra.mxu1 %v279_v6 }
   0x9   :  { %250 = vmatmul.mubr.msk.bf16.vlgmr.msra.gmra.mrb[0].mxu0 %vm47_vm1, %v23_v5 }
   0xa   :  { %10 = vsyncpa [#allocation3], 0  ;;  %257 = vmatprep.subr.bf16.mxu1 %v312_v1  ;;  %v281_v8 = vld [vmem:[%s399_s3 + $0x18] sm:$0xff]   ;;  %v282_v9 = vld [vmem:[%s399_s3 + $0x20] sm:$0xff]   ;;  %s314_s17 = smov [#allocation2]   ;;  %vm204_vm2 = vcmask 130048  }
   0xb   :  { %v283_v10 = vld [vmem:[%s399_s3 + $0x28] sm:$0xff]   ;;  %v284_v11 = vld [vmem:[%s399_s3 + $0x30] sm:$0xff]   ;;  %v285_v12 = vld [vmem:[%s399_s3 + $0x38] sm:$0xff]   ;;  %s212_s3 = sshll.u32 %s314_s17, 4  ;;  %s213_s3 = int_to_ptr.vmem [resolvable:$true] %s212_s3 }
   0xc   :  { %258 = vmatpush3.bf16.msra.mxu1 %v280_v7  ;;  %v220_v13 = vld [vmem:[%s398_s2] ss:$0 sm:$0xff]  ;;  %s288_s2 = scalar_lea.vmem %s213_s3, 128  ;;  %p293_p1 = scmp.lt.s32.totalorder %s213_s3, %s213_s3 }
   0xd   :  { %259 = vmatprep.subr.bf16.mxu1 %v312_v1  ;;  %v224_v21 = vld [vmem:[%s400_s4] ss:$0 sm:$0xff]  ;;  %p289_p0 = scmp.ne.s32.totalorder %s213_s3, %s288_s2  ;;  %p294_p2 = scmp.lt.s32.totalorder %s288_s2, %s288_s2 }
   0xf   :  { %p295_p3 = por %p294_p2, %p293_p1 }
  0x10   :  { %260 = vmatpush3.bf16.msra.mxu1 %v281_v8 }
  0x11   :  { %261 = vmatprep.subr.bf16.mxu1 %v312_v1  ;;  %p296_p4 = pnand %p295_p3, %p289_p0 }
  0x14   :  { %262 = vmatpush3.bf16.msra.mxu1 %v282_v9 }
  0x15   :  { %263 = vmatprep.subr.bf16.mxu1 %v312_v1 }
  0x18   :  { %264 = vmatpush3.bf16.msra.mxu1 %v283_v10 }
  0x19   :  { %265 = vmatprep.subr.bf16.mxu1 %v312_v1 }
  0x1c   :  { %266 = vmatpush3.bf16.msra.mxu1 %v284_v11 }
  0x1d   :  { %267 = vmatprep.subr.bf16.mxu1 %v312_v1 }
  0x20   :  { %268 = vmatpush3.bf16.msra.mxu1 %v285_v12 }
  0xdc   :  { %v85_v14 = vpop.f32.mrb[0].mxu0 }
  0xdd   :  { %v86_v15 = vadd.f32 %v220_v13, %v85_v14  ;;  %v251_v16 = vpop.f32.mrb[1].mxu0 }
  0xde   :  { %v88_v17 = vpop.f32.mrb[2].mxu0 }
  0xdf   :  { %286 = vtanh.f32 %v86_v15  ;;  %v252_v18 = vpop.f32.mrb[3].mxu0 }
  0xe9   :  { %v287_v19 = vpop.eup %286 }
  0xea   :  { %v92_v20 = vpack.c.bf16 %v287_v19, %v287_v19 }
  0xec   :  { %270 = vmatmul.mubr.bf16.vlgmr.msra.gmra.mrb[0].mxu1 %v92_v20 }
 0x1bf   :  { %v198_v22 = vpop.f32.mrb[0].mxu1 }
 0x1c0   :  { %v199_v23 = vadd.f32 %v224_v21, %v198_v22  ;;  %v271_v24 = vpop.f32.mrb[1].mxu1 }
 0x1c1   :  { %v201_v25 = vpop.f32.mrb[2].mxu1 }
 0x1c2   :  { %v272_v26 = vpop.f32.mrb[3].mxu1  ;;  %205 = vst.msk [vmem:[#allocation2] sm:$0xff] %vm204_vm2, %v199_v23 }
 0x1c3   :  { %299 = shalt.err (!%p296_p4)
}
 0x1c4   :  { %s300_s4 = scalar_lea.hbm %s401_s5, 128 }
 0x1c5   :  { %p301_p5 = scmp.ne.s32.totalorder %s401_s5, %s300_s4  ;;  %p304_p6 = scmp.lt.u32.totalorder %s300_s4, %s401_s5 }
 0x1c7   :  { %p306_p7 = pnand %p304_p6, %p301_p5 }
 0x1c9   :  { %309 = shalt.err (!%p306_p7)
}
 0x1ca   :  { %215 = dma.vmem_to_hbm [thread:$0]  %s213_s3, 128, %s401_s5, [#allocation3]  }
 0x1cb   :  { %310 = dma.done.wait [#allocation3], 128  }
 0x1cc   :  { %311 = vsyncadd [#allocation3], 4294967168 }
 0x1cd   :  { %219 = vsyncpa [#allocation3], 1 }

// kernel: tpu_custom_call.1
= control target key start
LH: loop header
LB: loop body
LE: loop exit
PB: predicated region body
PF: predicated region fallthrough
CT: control target
= control target key end

     0   :  { %v312_v1 = vmov 0.0   ;;  %vm313_vm0 = vmmov 0   ;;  %vm47_vm1 = vcmask 261120   ;;  %s396_s0 = inlined_call_operand.vmem [shape: f32[8,32], index: 0, kind: input, shape index: {}]   ;;  %s397_s1 = inlined_call_operand.vmem [shape: bf16[32,128], index: 1, kind: input, shape index: {}]   ;;  %s398_s2 = inlined_call_operand.vmem [shape: f32[1,128], index: 2, kind: input, shape index: {}]   ;;  %s399_s3 = inlined_call_operand.vmem [shape: bf16[128,16], index: 3, kind: input, shape index: {}]   ;;  %s400_s4 = inlined_call_operand.vmem [shape: f32[1,16], index: 4, kind: input, shape index: {}]   ;;  %s401_s5 = inlined_call_operand.hbm [shape: f32[8,16], index: 5, kind: output, shape index: {}]  }
   0x1   :  { %v276_v0 = vld [vmem:[%s397_s1] sm:$0xff]   ;;  %245 = vmatprep.subr.bf16.mxu0 %v312_v1  ;;  %v277_v2 = vld [vmem:[%s397_s1 + $0x8] sm:$0xff]   ;;  %253 = vmatprep.subr.bf16.mxu1 %v312_v1  ;;  %v280_v7 = vld [vmem:[%s399_s3 + $0x10] sm:$0xff]  }
   0x2   :  { %246 = vmatpush3.bf16.msra.mxu0 %v276_v0  ;;  %249 = vmatprep.mubr.msk.bf16.mxu0 %vm313_vm0, %v312_v1  ;;  %v22_v3 = vld [vmem:[%s396_s0] sm:$0xff]  ;;  %v279_v6 = vld [vmem:[%s399_s3 + $0x8] sm:$0xff]  }
   0x3   :  { %247 = vmatprep.subr.bf16.mxu0 %v312_v1  ;;  %v278_v4 = vld [vmem:[%s399_s3] sm:$0xff]   ;;  %269 = vmatprep.mubr.msk.bf16.mxu1 %vm313_vm0, %v312_v1  ;;  %v23_v5 = vpack.c.bf16 %v22_v3, %v22_v3 }
   0x4   :  { %254 = vmatpush3.bf16.msra.mxu1 %v278_v4 }
   0x5   :  { %255 = vmatprep.subr.bf16.mxu1 %v312_v1 }
   0x6   :  { %248 = vmatpush3.bf16.msra.mxu0 %v277_v2 }
   0x8   :  { %256 = vmatpush3.bf16.msra.mxu1 %v279_v6 }
   0x9   :  { %250 = vmatmul.mubr.msk.bf16.vlgmr.msra.gmra.mrb[0].mxu0 %vm47_vm1, %v23_v5 }
   0xa   :  { %10 = vsyncpa [#allocation3], 0  ;;  %257 = vmatprep.subr.bf16.mxu1 %v312_v1  ;;  %v281_v8 = vld [vmem:[%s399_s3 + $0x18] sm:$0xff]   ;;  %v282_v9 = vld [vmem:[%s399_s3 + $0x20] sm:$0xff]   ;;  %s314_s17 = smov [#allocation2]   ;;  %vm204_vm2 = vcmask 130048  }
   0xb   :  { %v283_v10 = vld [vmem:[%s399_s3 + $0x28] sm:$0xff]   ;;  %v284_v11 = vld [vmem:[%s399_s3 + $0x30] sm:$0xff]   ;;  %v285_v12 = vld [vmem:[%s399_s3 + $0x38] sm:$0xff]   ;;  %s212_s3 = sshll.u32 %s314_s17, 4  ;;  %s213_s3 = int_to_ptr.vmem [resolvable:$true] %s212_s3 }
   0xc   :  { %258 = vmatpush3.bf16.msra.mxu1 %v280_v7  ;;  %v220_v13 = vld [vmem:[%s398_s2] ss:$0 sm:$0xff]  ;;  %s288_s2 = scalar_lea.vmem %s213_s3, 128  ;;  %p293_p1 = scmp.lt.s32.totalorder %s213_s3, %s213_s3 }
   0xd   :  { %259 = vmatprep.subr.bf16.mxu1 %v312_v1  ;;  %v224_v21 = vld [vmem:[%s400_s4] ss:$0 sm:$0xff]  ;;  %p289_p0 = scmp.ne.s32.totalorder %s213_s3, %s288_s2  ;;  %p294_p2 = scmp.lt.s32.totalorder %s288_s2, %s288_s2 }
   0xf   :  { %p295_p3 = por %p294_p2, %p293_p1 }
  0x10   :  { %260 = vmatpush3.bf16.msra.mxu1 %v281_v8 }
  0x11   :  { %261 = vmatprep.subr.bf16.mxu1 %v312_v1  ;;  %p296_p4 = pnand %p295_p3, %p289_p0 }
  0x14   :  { %262 = vmatpush3.bf16.msra.mxu1 %v282_v9 }
  0x15   :  { %263 = vmatprep.subr.bf16.mxu1 %v312_v1 }
  0x18   :  { %264 = vmatpush3.bf16.msra.mxu1 %v283_v10 }
  0x19   :  { %265 = vmatprep.subr.bf16.mxu1 %v312_v1 }
  0x1c   :  { %266 = vmatpush3.bf16.msra.mxu1 %v284_v11 }
  0x1d   :  { %267 = vmatprep.subr.bf16.mxu1 %v312_v1 }
  0x20   :  { %268 = vmatpush3.bf16.msra.mxu1 %v285_v12 }
  0xdc   :  { %v85_v14 = vpop.f32.mrb[0].mxu0 }
  0xdd   :  { %v86_v15 = vadd.f32 %v220_v13, %v85_v14  ;;  %v251_v16 = vpop.f32.mrb[1].mxu0 }
  0xde   :  { %v88_v17 = vpop.f32.mrb[2].mxu0 }
  0xdf   :  { %286 = vtanh.f32 %v86_v15  ;;  %v252_v18 = vpop.f32.mrb[3].mxu0 }
  0xe9   :  { %v287_v19 = vpop.eup %286 }
  0xea   :  { %v92_v20 = vpack.c.bf16 %v287_v19, %v287_v19 }
  0xec   :  { %270 = vmatmul.mubr.bf16.vlgmr.msra.gmra.mrb[0].mxu1 %v92_v20 }
 0x1bf   :  { %v198_v22 = vpop.f32.mrb[0].mxu1 }
 0x1c0   :  { %v199_v23 = vadd.f32 %v224_v21, %v198_v22  ;;  %v271_v24 = vpop.f32.mrb[1].mxu1 }
 0x1c1   :  { %v201_v25 = vpop.f32.mrb[2].mxu1 }
 0x1c2   :  { %v272_v26 = vpop.f32.mrb[3].mxu1  ;;  %205 = vst.msk [vmem:[#allocation2] sm:$0xff] %vm204_vm2, %v199_v23 }
 0x1c3   :  { %299 = shalt.err (!%p296_p4)
}
 0x1c4   :  { %s300_s4 = scalar_lea.hbm %s401_s5, 128 }
 0x1c5   :  { %p301_p5 = scmp.ne.s32.totalorder %s401_s5, %s300_s4  ;;  %p304_p6 = scmp.lt.u32.totalorder %s300_s4, %s401_s5 }
 0x1c7   :  { %p306_p7 = pnand %p304_p6, %p301_p5 }
 0x1c9   :  { %309 = shalt.err (!%p306_p7)
}
 0x1ca   :  { %215 = dma.vmem_to_hbm [thread:$0]  %s213_s3, 128, %s401_s5, [#allocation3]  }
 0x1cb   :  { %310 = dma.done.wait [#allocation3], 128  }
 0x1cc   :  { %311 = vsyncadd [#allocation3], 4294967168 }
 0x1cd   :  { %219 = vsyncpa [#allocation3], 1 }

</bundles_post_ra>
